<compile_context>
chip_gen: v7x
topology: tpu7x:2x2x1
jax: 0.10.0
libtpu: 0.0.40
codegen_flags: <defaults>
</compile_context>

<pallas_src>
import functools

import jax
import jax.numpy as jnp
import numpy as np
from jax import lax
from jax.experimental import pallas as pl
from jax.experimental.pallas import tpu as pltpu


def sa_layer_kernel(xf_ref, xq_ref, wq_ref, wv_ref, bv_ref, o_ref,
                    xk_ref, colsum_ref, *, inv_dk):
    q = pl.program_id(1)
    nq = pl.num_programs(1)

    # ---- once per batch: full key projection + zero the accumulators -------
    @pl.when(q == 0)
    def _():
        xk_ref[...] = jnp.dot(
            wq_ref[...], xf_ref[...],
            preferred_element_type=jnp.float32).astype(jnp.bfloat16)
        o_ref[...] = jnp.zeros_like(o_ref)
        colsum_ref[...] = jnp.zeros_like(colsum_ref)

    # ---- per query tile -----------------------------------------------------
    xq = xq_ref[...]                                        # (Cp, TQ) bf16
    # q_conv.weight == k_conv.weight, so the query projection reuses wq.
    xk_q = jnp.dot(wq_ref[...], xq,
                   preferred_element_type=jnp.float32).astype(jnp.bfloat16)
    xv_q = (jnp.dot(wv_ref[...], xq, preferred_element_type=jnp.float32)
            + bv_ref[...]).astype(jnp.bfloat16)             # (Cp, TQ)

    # energy tile (TQ, N): gram matrix — contract the channel axis directly,
    # no transpose / no materialized x_q.
    energy = lax.dot_general(
        xk_q, xk_ref[...], (((0,), (0,)), ((), ())),
        preferred_element_type=jnp.float32)                 # (TQ, N) f32

    # Row softmax in f32; reciprocal on the EUP.
    m = jnp.max(energy, axis=-1, keepdims=True)
    e = jnp.exp(energy - m)
    attn = e * pl.reciprocal(jnp.sum(e, axis=-1, keepdims=True), approx=True)

    # Accumulate attention column-sums and the un-normalized output.
    colsum_ref[...] += jnp.sum(attn, axis=0, keepdims=True)            # (1, N)
    o_ref[...] += jnp.dot(xv_q, attn.astype(jnp.bfloat16),
                          preferred_element_type=jnp.float32)          # (Cp, N)

    # ---- finalize: column normalization + /dk applied to the (Cp, N) output -
    @pl.when(q == nq - 1)
    def _():
        scale = pl.reciprocal(colsum_ref[...] + 1e-9, approx=True) * inv_dk
        o_ref[...] = o_ref[...] * scale


def _pick_tq(n):
    # Prefer 256-wide query tiles (v6e/v7x 256x256 MXU), fall back to 128
    # (v5e MXU width); otherwise process all queries in one tile.
    for t in (256, 128):
        if n % t == 0 and n > t:
            return t
    return n


def sa_layer(x, wq, wv, bv, *, tq=None):
    """x: (B, C, N); wq, wv: (C, C); bv: (C,). Returns (B, C, N) f32."""
    B, C, N = x.shape
    inv_dk = 1.0 / (float(C) ** 0.5)

    # Zero-pad channels to the bf16 sublane pack; padded rows/cols are inert.
    Cp = max(16, -(-C // 16) * 16)
    pc = Cp - C
    if pc:
        x = jnp.pad(x, ((0, 0), (0, pc), (0, 0)))
        wq = jnp.pad(wq, ((0, pc), (0, pc)))
        wv = jnp.pad(wv, ((0, pc), (0, pc)))
        bv = jnp.pad(bv, ((0, pc),))

    if tq is None:
        tq = _pick_tq(N)
    assert N % tq == 0, "N must be divisible by the query tile size"
    nq = N // tq

    x_b = x.astype(jnp.bfloat16)
    wq_b = wq.astype(jnp.bfloat16)
    wv_b = wv.astype(jnp.bfloat16)
    bv2d = bv.reshape(Cp, 1).astype(jnp.float32)

    # VMEM budget: x slab + query tiles + out accumulator (double-buffered),
    # key scratch, col-sum, and the (TQ, N) softmax temporaries (+headroom).
    est = (2 * Cp * N * 2          # x full slab, bf16, double-buffered
           + 2 * Cp * tq * 2       # x query tiles, bf16, double-buffered
           + 2 * Cp * N * 4        # f32 output accumulator, double-buffered
           + Cp * N * 2            # x_k scratch (bf16)
           + N * 4                 # column-sum scratch
           + 6 * tq * N * 4        # energy / exp / attn temporaries
           + 4 * Cp * Cp * 2 + 2 * Cp * 4)
    vmem_limit = int(min(48 * 2**20, max(24 * 2**20, 2 * est)))

    out = pl.pallas_call(
        functools.partial(sa_layer_kernel, inv_dk=inv_dk),
        out_shape=jax.ShapeDtypeStruct((B, Cp, N), jnp.float32),
        grid_spec=pltpu.PrefetchScalarGridSpec(
            num_scalar_prefetch=0,
            grid=(B, nq),
            in_specs=[
                pl.BlockSpec((None, Cp, N), lambda b, q: (b, 0, 0)),    # x, full slab (keys)
                pl.BlockSpec((None, Cp, tq), lambda b, q: (b, 0, q)),   # x, query column tile
                pl.BlockSpec((Cp, Cp), lambda b, q: (0, 0)),            # shared q/k weight
                pl.BlockSpec((Cp, Cp), lambda b, q: (0, 0)),            # v weight
                pl.BlockSpec((Cp, 1), lambda b, q: (0, 0)),             # v bias
            ],
            out_specs=pl.BlockSpec((None, Cp, N), lambda b, q: (b, 0, 0)),
            scratch_shapes=[
                pltpu.VMEM((Cp, N), jnp.bfloat16),   # x_k (keys), resident per batch
                pltpu.VMEM((1, N), jnp.float32),     # attention column-sum accumulator
            ],
        ),
        compiler_params=pltpu.CompilerParams(
            dimension_semantics=("parallel", "arbitrary"),
            vmem_limit_bytes=vmem_limit,
        ),
    )(x_b, x_b, wq_b, wv_b, bv2d)

    return out[:, :C, :] if pc else out


def sa_layer_ref(x, wq, wv, bv):
    """Pure-JAX f32 reference mirroring the PyTorch forward."""
    dk = float(x.shape[1]) ** 0.5
    x_k = jnp.einsum("oc,bcn->bon", wq, x)                   # k_conv(x)
    x_q = jnp.transpose(x_k, (0, 2, 1))                      # q_conv(x).permute(0,2,1)
    x_v = jnp.einsum("oc,bcn->bon", wv, x) + bv[None, :, None]
    energy = jnp.einsum("bnc,bcm->bnm", x_q, x_k)
    attn = jax.nn.softmax(energy, axis=-1)
    attn = attn / (1e-9 + jnp.sum(attn, axis=1, keepdims=True))
    attn = attn / dk
    return jnp.einsum("bcn,bnm->bcm", x_v, attn)


if __name__ == "__main__":
    B, C, N = 2, 4, 16
    key = jax.random.PRNGKey(0)
    kx, kq, kv, kb = jax.random.split(key, 4)

    x = jax.random.normal(kx, (B, C, N), dtype=jnp.float32) * 0.5
    wq = jax.random.normal(kq, (C, C), dtype=jnp.float32) * 0.3   # q_conv.weight == k_conv.weight
    wv = jax.random.normal(kv, (C, C), dtype=jnp.float32) * 0.3   # v_conv.weight
    bv = jax.random.normal(kb, (C,), dtype=jnp.float32) * 0.1     # v_conv.bias

    out = jax.block_until_ready(sa_layer(x, wq, wv, bv))
    ref = jax.block_until_ready(sa_layer_ref(x, wq, wv, bv))
    # bf16 matmul operands (f32 accumulation) -> loosened tolerance.
    np.testing.assert_allclose(np.asarray(out), np.asarray(ref),
                               rtol=2e-2, atol=2e-2)
    print("KERNEL_OK")
</pallas_src>

<mosaic_0001>
module attributes {stable_mosaic.version = 11 : i64} {
  func.func @sa_layer_kernel(%arg0: i32, %arg1: i32, %arg2: memref<1x16x16xbf16, #tpu.memory_space<vmem>>, %arg3: memref<1x16x16xbf16, #tpu.memory_space<vmem>>, %arg4: memref<16x16xbf16, #tpu.memory_space<vmem>>, %arg5: memref<16x16xbf16, #tpu.memory_space<vmem>>, %arg6: memref<16x1xf32, #tpu.memory_space<vmem>>, %arg7: memref<1x16x16xf32, #tpu.memory_space<vmem>>, %arg8: memref<16x16xbf16, #tpu.memory_space<vmem>>, %arg9: memref<1x16xf32, #tpu.memory_space<vmem>>) attributes {dimension_semantics = [#tpu.dimension_semantics<parallel>, #tpu.dimension_semantics<arbitrary>], iteration_bounds = array<i64: 2, 1>, scalar_prefetch = 0 : i64, scratch_operands = 2 : i64, tpu.core_type = #tpu.core_type<tc>, window_params = [{transform_indices = @transform_0, window_bounds = array<i64: 1, 16, 16>}, {transform_indices = @transform_1, window_bounds = array<i64: 1, 16, 16>}, {pipeline_mode = #tpu.pipeline_mode<synchronous>, transform_indices = @transform_2, window_bounds = array<i64: 16, 16>}, {pipeline_mode = #tpu.pipeline_mode<synchronous>, transform_indices = @transform_3, window_bounds = array<i64: 16, 16>}, {pipeline_mode = #tpu.pipeline_mode<synchronous>, transform_indices = @transform_4, window_bounds = array<i64: 16, 1>}, {transform_indices = @transform_5, window_bounds = array<i64: 1, 16, 16>}]} {
    %c0_i32 = arith.constant 0 : i32
    %0 = arith.cmpi eq, %arg1, %c0_i32 : i32
    %1 = arith.extui %0 : i1 to i32
    %c0_i32_0 = arith.constant 0 : i32
    %2 = arith.cmpi ne, %1, %c0_i32_0 : i32
    scf.if %2 {
      %c0_29 = arith.constant 0 : index
      %c0_30 = arith.constant 0 : index
      %42 = vector.load %arg4[%c0_29, %c0_30] : memref<16x16xbf16, #tpu.memory_space<vmem>>, vector<16x16xbf16>
      %c0_31 = arith.constant 0 : index
      %c0_32 = arith.constant 0 : index
      %c0_33 = arith.constant 0 : index
      %43 = vector.load %arg2[%c0_31, %c0_32, %c0_33] : memref<1x16x16xbf16, #tpu.memory_space<vmem>>, vector<1x16x16xbf16>
      %44 = vector.shape_cast %43 : vector<1x16x16xbf16> to vector<16x16xbf16>
      %cst_34 = arith.constant dense<0.000000e+00> : vector<16x16xf32>
      %45 = tpu.matmul %42, %44, %cst_34 {dimension_numbers = #tpu.dot_dimension_numbers<[1], [0], [0], [1], [0, 0, 1, 1], [], []>} : vector<16x16xbf16>, vector<16x16xbf16>, vector<16x16xf32> -> vector<16x16xf32>
      %46 = arith.truncf %45 : vector<16x16xf32> to vector<16x16xbf16>
      %c0_35 = arith.constant 0 : index
      %c0_36 = arith.constant 0 : index
      %47 = vector.load %arg8[%c0_35, %c0_36] : memref<16x16xbf16, #tpu.memory_space<vmem>>, vector<16x16xbf16>
      tpu.vector_store %arg8[%c0_35, %c0_36], %46 {strides = array<i32>} : memref<16x16xbf16, #tpu.memory_space<vmem>>, vector<16x16xbf16>,
      %cst_37 = arith.constant 0.000000e+00 : f32
      %48 = vector.broadcast %cst_37 : f32 to vector<16x16xf32>
      %c0_38 = arith.constant 0 : index
      %c0_39 = arith.constant 0 : index
      %c0_40 = arith.constant 0 : index
      %49 = vector.load %arg7[%c0_38, %c0_39, %c0_40] : memref<1x16x16xf32, #tpu.memory_space<vmem>>, vector<1x16x16xf32>
      %50 = vector.shape_cast %49 : vector<1x16x16xf32> to vector<16x16xf32>
      %51 = vector.shape_cast %48 : vector<16x16xf32> to vector<1x16x16xf32>
      tpu.vector_store %arg7[%c0_38, %c0_39, %c0_40], %51 {strides = array<i32>} : memref<1x16x16xf32, #tpu.memory_space<vmem>>, vector<1x16x16xf32>,
      %cst_41 = arith.constant 0.000000e+00 : f32
      %52 = vector.broadcast %cst_41 : f32 to vector<1x16xf32>
      %c0_42 = arith.constant 0 : index
      %c0_43 = arith.constant 0 : index
      %53 = vector.load %arg9[%c0_42, %c0_43] : memref<1x16xf32, #tpu.memory_space<vmem>>, vector<1x16xf32>
      tpu.vector_store %arg9[%c0_42, %c0_43], %52 {strides = array<i32>} : memref<1x16xf32, #tpu.memory_space<vmem>>, vector<1x16xf32>,
    } else {
    }
    %c0 = arith.constant 0 : index
    %c0_1 = arith.constant 0 : index
    %c0_2 = arith.constant 0 : index
    %3 = vector.load %arg3[%c0, %c0_1, %c0_2] : memref<1x16x16xbf16, #tpu.memory_space<vmem>>, vector<1x16x16xbf16>
    %4 = vector.shape_cast %3 : vector<1x16x16xbf16> to vector<16x16xbf16>
    %c0_3 = arith.constant 0 : index
    %c0_4 = arith.constant 0 : index
    %5 = vector.load %arg4[%c0_3, %c0_4] : memref<16x16xbf16, #tpu.memory_space<vmem>>, vector<16x16xbf16>
    %cst = arith.constant dense<0.000000e+00> : vector<16x16xf32>
    %6 = tpu.matmul %5, %4, %cst {dimension_numbers = #tpu.dot_dimension_numbers<[1], [0], [0], [1], [0, 0, 1, 1], [], []>} : vector<16x16xbf16>, vector<16x16xbf16>, vector<16x16xf32> -> vector<16x16xf32>
    %7 = arith.truncf %6 : vector<16x16xf32> to vector<16x16xbf16>
    %c0_5 = arith.constant 0 : index
    %c0_6 = arith.constant 0 : index
    %8 = vector.load %arg5[%c0_5, %c0_6] : memref<16x16xbf16, #tpu.memory_space<vmem>>, vector<16x16xbf16>
    %cst_7 = arith.constant dense<0.000000e+00> : vector<16x16xf32>
    %9 = tpu.matmul %8, %4, %cst_7 {dimension_numbers = #tpu.dot_dimension_numbers<[1], [0], [0], [1], [0, 0, 1, 1], [], []>} : vector<16x16xbf16>, vector<16x16xbf16>, vector<16x16xf32> -> vector<16x16xf32>
    %c0_8 = arith.constant 0 : index
    %c0_9 = arith.constant 0 : index
    %10 = vector.load %arg6[%c0_8, %c0_9] : memref<16x1xf32, #tpu.memory_space<vmem>>, vector<16x1xf32>
    %11 = vector.broadcast %10 : vector<16x1xf32> to vector<16x16xf32>
    %12 = arith.addf %9, %11 : vector<16x16xf32>
    %13 = arith.truncf %12 : vector<16x16xf32> to vector<16x16xbf16>
    %c0_10 = arith.constant 0 : index
    %c0_11 = arith.constant 0 : index
    %14 = vector.load %arg8[%c0_10, %c0_11] : memref<16x16xbf16, #tpu.memory_space<vmem>>, vector<16x16xbf16>
    %cst_12 = arith.constant dense<0.000000e+00> : vector<16x16xf32>
    %15 = tpu.matmul %7, %14, %cst_12 {dimension_numbers = #tpu.dot_dimension_numbers<[0], [0], [1], [1], [0, 1, 1, 1], [], []>} : vector<16x16xbf16>, vector<16x16xbf16>, vector<16x16xf32> -> vector<16x16xf32>
    %cst_13 = arith.constant dense<0xFF800000> : vector<16xf32>
    %16 = vector.multi_reduction <maximumf>, %15, %cst_13 [1] : vector<16x16xf32> to vector<16xf32>
    %17 = vector.shape_cast %16 : vector<16xf32> to vector<16x1xf32>
    %18 = vector.broadcast %17 : vector<16x1xf32> to vector<16x16xf32>
    %19 = arith.subf %15, %18 : vector<16x16xf32>
    %20 = math.exp %19 : vector<16x16xf32>
    %cst_14 = arith.constant dense<0.000000e+00> : vector<16xf32>
    %21 = vector.multi_reduction <add>, %20, %cst_14 [1] : vector<16x16xf32> to vector<16xf32>
    %22 = vector.shape_cast %21 : vector<16xf32> to vector<16x1xf32>
    %23 = tpu.reciprocal %22 {approx = true} : vector<16x1xf32> -> vector<16x1xf32>
    %24 = vector.broadcast %23 : vector<16x1xf32> to vector<16x16xf32>
    %25 = arith.mulf %20, %24 : vector<16x16xf32>
    %c0_15 = arith.constant 0 : index
    %c0_16 = arith.constant 0 : index
    %26 = vector.load %arg9[%c0_15, %c0_16] : memref<1x16xf32, #tpu.memory_space<vmem>>, vector<1x16xf32>
    %cst_17 = arith.constant dense<0.000000e+00> : vector<16xf32>
    %27 = vector.multi_reduction <add>, %25, %cst_17 [0] : vector<16x16xf32> to vector<16xf32>
    %28 = vector.shape_cast %27 : vector<16xf32> to vector<1x16xf32>
    %29 = arith.addf %26, %28 : vector<1x16xf32>
    %c0_18 = arith.constant 0 : index
    %c0_19 = arith.constant 0 : index
    %30 = vector.load %arg9[%c0_18, %c0_19] : memref<1x16xf32, #tpu.memory_space<vmem>>, vector<1x16xf32>
    tpu.vector_store %arg9[%c0_18, %c0_19], %29 {strides = array<i32>} : memref<1x16xf32, #tpu.memory_space<vmem>>, vector<1x16xf32>,
    %c0_20 = arith.constant 0 : index
    %c0_21 = arith.constant 0 : index
    %c0_22 = arith.constant 0 : index
    %31 = vector.load %arg7[%c0_20, %c0_21, %c0_22] : memref<1x16x16xf32, #tpu.memory_space<vmem>>, vector<1x16x16xf32>
    %32 = vector.shape_cast %31 : vector<1x16x16xf32> to vector<16x16xf32>
    %33 = arith.truncf %25 : vector<16x16xf32> to vector<16x16xbf16>
    %cst_23 = arith.constant dense<0.000000e+00> : vector<16x16xf32>
    %34 = tpu.matmul %13, %33, %cst_23 {dimension_numbers = #tpu.dot_dimension_numbers<[1], [0], [0], [1], [0, 0, 1, 1], [], []>} : vector<16x16xbf16>, vector<16x16xbf16>, vector<16x16xf32> -> vector<16x16xf32>
    %35 = arith.addf %32, %34 : vector<16x16xf32>
    %c0_24 = arith.constant 0 : index
    %c0_25 = arith.constant 0 : index
    %c0_26 = arith.constant 0 : index
    %36 = vector.load %arg7[%c0_24, %c0_25, %c0_26] : memref<1x16x16xf32, #tpu.memory_space<vmem>>, vector<1x16x16xf32>
    %37 = vector.shape_cast %36 : vector<1x16x16xf32> to vector<16x16xf32>
    %38 = vector.shape_cast %35 : vector<16x16xf32> to vector<1x16x16xf32>
    tpu.vector_store %arg7[%c0_24, %c0_25, %c0_26], %38 {strides = array<i32>} : memref<1x16x16xf32, #tpu.memory_space<vmem>>, vector<1x16x16xf32>,
    %c0_i32_27 = arith.constant 0 : i32
    %39 = arith.cmpi eq, %arg1, %c0_i32_27 : i32
    %40 = arith.extui %39 : i1 to i32
    %c0_i32_28 = arith.constant 0 : i32
    %41 = arith.cmpi ne, %40, %c0_i32_28 : i32
    scf.if %41 {
      %c0_29 = arith.constant 0 : index
      %c0_30 = arith.constant 0 : index
      %42 = vector.load %arg9[%c0_29, %c0_30] : memref<1x16xf32, #tpu.memory_space<vmem>>, vector<1x16xf32>
      %cst_31 = arith.constant 9.99999971E-10 : f32
      %43 = vector.broadcast %cst_31 : f32 to vector<1x16xf32>
      %44 = arith.addf %42, %43 : vector<1x16xf32>
      %45 = tpu.reciprocal %44 {approx = true} : vector<1x16xf32> -> vector<1x16xf32>
      %cst_32 = arith.constant 5.000000e-01 : f32
      %46 = vector.broadcast %cst_32 : f32 to vector<1x16xf32>
      %47 = arith.mulf %45, %46 : vector<1x16xf32>
      %c0_33 = arith.constant 0 : index
      %c0_34 = arith.constant 0 : index
      %c0_35 = arith.constant 0 : index
      %48 = vector.load %arg7[%c0_33, %c0_34, %c0_35] : memref<1x16x16xf32, #tpu.memory_space<vmem>>, vector<1x16x16xf32>
      %49 = vector.shape_cast %48 : vector<1x16x16xf32> to vector<16x16xf32>
      %50 = vector.broadcast %47 : vector<1x16xf32> to vector<16x16xf32>
      %51 = arith.mulf %49, %50 : vector<16x16xf32>
      %c0_36 = arith.constant 0 : index
      %c0_37 = arith.constant 0 : index
      %c0_38 = arith.constant 0 : index
      %52 = vector.load %arg7[%c0_36, %c0_37, %c0_38] : memref<1x16x16xf32, #tpu.memory_space<vmem>>, vector<1x16x16xf32>
      %53 = vector.shape_cast %52 : vector<1x16x16xf32> to vector<16x16xf32>
      %54 = vector.shape_cast %51 : vector<16x16xf32> to vector<1x16x16xf32>
      tpu.vector_store %arg7[%c0_36, %c0_37, %c0_38], %54 {strides = array<i32>} : memref<1x16x16xf32, #tpu.memory_space<vmem>>, vector<1x16x16xf32>,
    } else {
    }
    return
  }
  func.func @transform_0(%arg0: i32, %arg1: i32) -> (i32, i32, i32) {
    %c0_i32 = arith.constant 0 : i32
    %c0_i32_0 = arith.constant 0 : i32
    %c0_i32_1 = arith.constant 0 : i32
    return %arg0, %c0_i32, %c0_i32_0 : i32, i32, i32
  }
  func.func @transform_1(%arg0: i32, %arg1: i32) -> (i32, i32, i32) {
    %c0_i32 = arith.constant 0 : i32
    %c0_i32_0 = arith.constant 0 : i32
    return %arg0, %c0_i32, %arg1 : i32, i32, i32
  }
  func.func @transform_2(%arg0: i32, %arg1: i32) -> (i32, i32) {
    %c0_i32 = arith.constant 0 : i32
    %c0_i32_0 = arith.constant 0 : i32
    %c0_i32_1 = arith.constant 0 : i32
    return %c0_i32, %c0_i32_0 : i32, i32
  }
  func.func @transform_3(%arg0: i32, %arg1: i32) -> (i32, i32) {
    %c0_i32 = arith.constant 0 : i32
    %c0_i32_0 = arith.constant 0 : i32
    %c0_i32_1 = arith.constant 0 : i32
    return %c0_i32, %c0_i32_0 : i32, i32
  }
  func.func @transform_4(%arg0: i32, %arg1: i32) -> (i32, i32) {
    %c0_i32 = arith.constant 0 : i32
    %c0_i32_0 = arith.constant 0 : i32
    %c0_i32_1 = arith.constant 0 : i32
    return %c0_i32, %c0_i32_0 : i32, i32
  }
  func.func @transform_5(%arg0: i32, %arg1: i32) -> (i32, i32, i32) {
    %c0_i32 = arith.constant 0 : i32
    %c0_i32_0 = arith.constant 0 : i32
    %c0_i32_1 = arith.constant 0 : i32
    return %arg0, %c0_i32, %c0_i32_0 : i32, i32, i32
  }
}

</mosaic_0001>

<bundles_post_ra>
// kernel: tpu_custom_call.1
= control target key start
LH: loop header
LB: loop body
LE: loop exit
PB: predicated region body
PF: predicated region fallthrough
CT: control target
= control target key end

     0   :  { %10 = vsyncpa [#allocation5], 0  ;;  %s1423_s0 = inlined_call_operand.vmem [shape: bf16[2,16,16], index: 0, kind: input, shape index: {}]   ;;  %s1424_s1 = inlined_call_operand.hbm [shape: bf16[2,16,16], index: 1, kind: input, shape index: {}]   ;;  %s1425_s2 = inlined_call_operand.vmem [shape: bf16[16,16], index: 2, kind: input, shape index: {}]   ;;  %s1426_s3 = inlined_call_operand.hbm [shape: bf16[16,16], index: 3, kind: input, shape index: {}]   ;;  %s1427_s4 = inlined_call_operand.vmem [shape: f32[16,1], index: 4, kind: input, shape index: {}]   ;;  %s1428_s5 = inlined_call_operand.hbm [shape: f32[2,16,16], index: 5, kind: output, shape index: {}]  }
   0x1   :  { %12 = vsyncpa [#allocation5 + $0x1], 0 }
   0x2   :  { %13 = vsyncpa [#allocation8], 0 }
   0x3   :  { %14 = vsyncpa [#allocation6], 0 }
   0x4   :  { %16 = vsyncpa [#allocation6 + $0x1], 0  ;;  %s1129_s18 = smov 0   ;;  %s1131_s19 = smov 0  }
   0x5   :  { %s1133_s20 = smov 0   ;;  %s1135_s21 = smov 0  }
   0x6   :  { %s1137_s22 = smov 0   ;;  %s1139_s23 = smov 0  }
   0x7 LB: > { %s774_s24 = sadd.s32 4294967295, %s1087_s23   ;;  %s775_s25 = sadd.s32 4294967294, %s1087_s23   ;;  %s1087_s23 = sphi %s1139_s23, %s22_s23   ;;  %s1083_s22 = sphi %s1137_s22, %s1454_s22   ;;  %s1079_s21 = sphi %s1135_s21, %s1453_s21   ;;  %s1075_s20 = sphi %s1133_s20, %s1452_s20   ;;  %s1071_s19 = sphi %s1131_s19, %s1451_s19   ;;  %s1067_s18 = sphi %s1129_s18, %s1450_s18  }
   0x8   : > { %p82_p0 = scmp.ne.s32.totalorder %s1071_s19, %s1067_s18  ;;  %p1163_p1 = scmp.eq.s32.totalorder %s774_s24, 0 }
   0x9   : > { %p1167_p2 = scmp.eq.s32.totalorder %s774_s24, 1  ;;  %p175_p3 = scmp.eq.s32.totalorder %s775_s25, 1 }
   0xa   : > { %s1434_s26 = scalar_select %p1163_p1, 1, 0 }
   0xb   : > { %s1435_s27 = scalar_select %p1167_p2, 1, 0 }
   0xc   : > { %p1173_p4 = por %p1163_p1, %p82_p0  ;;  %p776_p5 = scmp.ge.s32.totalorder %s1087_s23, 1 }
   0xd   : > { %p1178_p6 = por %p175_p3, %p82_p0  ;;  %p182_p7 = scmp.lt.s32.totalorder %s1087_s23, 3 }
   0xe   : > { %s1436_s28 = scalar_select %p1173_p4, 1, 0 }
   0xf   : > { %s1437_s29 = scalar_select %p1178_p6, 1, 0 }
  0x10   : > { %p1183_p8 = pnand %p776_p5, %p182_p7  ;;  %s1089_s6 = smov [#allocation7]  }
  0x11   : > { %s197_s7 = sshll.u32 %s1089_s6, 4  ;;  %s34_s9 = sadd.s32 1, %s1083_s22  ;;  %s198_s7 = int_to_ptr.vmem [resolvable:$true] %s197_s7 }
  0x12   : > { %s1438_s30 = scalar_select %p1183_p8, 1, 0 }
  0x13   : > { %p854_p9 = pneg %p1183_p8  ;;  %s943_s12 = scalar_lea.hbm %s1426_s3, 128 }
  0x14   : > { %p944_p12 = scmp.ne.s32.totalorder %s1426_s3, %s943_s12  ;;  %p950_p5 = scmp.lt.u32.totalorder %s943_s12, %s1426_s3 }
  0x15   : > { %p1192_p11 = pnand %p854_p9, %p1163_p1 }
  0x17   : > { %p945_p13 = pneg %p1192_p11 }
  0x19   : > { %p946_p0 = pnand %p945_p13, %p944_p12 }
  0x1b   : > { %p947_p3 = pneg %p946_p0 }
  0x1d   : > { %p952_p7 = pnand %p950_p5, %p947_p3 }
  0x1f   : > { %955 = shalt.err (!%p952_p7)
}
  0x20   : > { %s956_s17 = scalar_lea.vmem %s198_s7, 128  ;;  %p964_p1 = scmp.lt.s32.totalorder %s198_s7, %s198_s7 }
  0x21   : > { %p957_p9 = scmp.ne.s32.totalorder %s198_s7, %s956_s17  ;;  %p965_p4 = scmp.lt.s32.totalorder %s956_s17, %s956_s17 }
  0x23   : > { %p959_p10 = pnand %p957_p9, %p945_p13  ;;  %p966_p8 = por %p965_p4, %p964_p1 }
  0x25   : > { %p960_p6 = pneg %p959_p10 }
  0x27   : > { %p967_p2 = pnand %p966_p8, %p960_p6 }
  0x29   : > { %970 = shalt.err (!%p967_p2)
}
  0x2a   : > { %s1433_s24 = smov 64   ;;  %s1091_s25 = smov 4  }
  0x2b   : > { %857 = dma.hbm_to_vmem [thread:$0]  (!%p1192_p11), %s1426_s3, 128, %s198_s7, [#allocation8], %s1433_s24, %s1433_s24, %s1091_s25  }
  0x2c   : > { %p36_p1 = scmp.ge.s32.totalorder %s34_s9, 2  ;;  %s69_s11 = sadd.s32 1, %s1075_s20 }
  0x2d   : > { %p76_p2 = scmp.ne.s32.totalorder %s1075_s20, %s1071_s19  ;;  %p77_p4 = scmp.eq.s32.totalorder %s1087_s23, 0 }
  0x2e   : > { %s1456_s9 = smov (%p36_p1, %s34_s9), 0  ;;  %p1441_p8 = scmp.ne.s32.totalorder %s1435_s27, 0 }
  0x2f   : > { %p1222_p6 = por %p77_p4, %p76_p2  ;;  %s64_s13 = ssub.s32 %s1083_s22, %s1456_s9 }
  0x30   : > { %p1228_p10 = por %p1441_p8, %p76_p2  ;;  %p867_p12 = scmp.lt.s32.totalorder %s1087_s23, 2 }
  0x31   : > { %p67_p11 = scmp.eq.s32.totalorder %s64_s13, 0  ;;  %s222_s7 = sand.u32 1, %s1075_s20  }
  0x32   : > { %s779_s14 = sshll.u32 %s222_s7, 3  ;;  %s803_s16 = sshll.u32 %s1083_s22, 7 }
  0x33   : > { %s1237_s15 = scalar_select %p67_p11, %s1075_s20, %s69_s11  }
  0x34   : > { %s1243_s10 = scalar_lea.hbm %s1424_s1, %s803_s16  ;;  %s226_s27 = scalar_lea.vmem [#allocation4], %s779_s14 }
  0x35   : > { %s234_s24 = sshll.u32 %s226_s27, 4  ;;  %p1249_p13 = pnand %p867_p12, %p1222_p6  ;;  %s1245_s24 = int_to_ptr.vmem [resolvable:$true] %s234_s24 }
  0x36   : > { %s1253_s11 = scalar_lea.sflag [#allocation5], %s222_s7  ;;  %s971_s17 = scalar_lea.hbm %s1243_s10, 128 }
  0x37   : > { %p972_p0 = scmp.ne.s32.totalorder %s1243_s10, %s971_s17  ;;  %p973_p3 = pneg %p1249_p13 }
  0x38   : > { %s976_s12 = scalar_lea.hbm %s1424_s1, 256  ;;  %p977_p9 = scmp.lt.u32.totalorder %s1243_s10, %s1424_s1 }
  0x39   : > { %p974_p5 = pnand %p973_p3, %p972_p0  ;;  %p978_p1 = scmp.lt.u32.totalorder %s976_s12, %s971_s17 }
  0x3a   : > { %p980_p4 = scmp.lt.u32.totalorder %s971_s17, %s1243_s10 }
  0x3b   : > { %p975_p7 = pneg %p974_p5  ;;  %p979_p2 = por %p978_p1, %p977_p9 }
  0x3d   : > { %p981_p6 = por %p980_p4, %p979_p2 }
  0x3f   : > { %p982_p8 = pnand %p981_p6, %p975_p7 }
  0x41   : > { %985 = shalt.err (!%p982_p8)
}
  0x42   : > { %s986_s7 = scalar_lea.vmem %s1245_s24, 128  ;;  %s1092_s14 = smov [#allocation4]  }
  0x43   : > { %p987_p12 = scmp.ne.s32.totalorder %s1245_s24, %s986_s7  ;;  %s991_s16 = sshll.u32 %s1092_s14, 4  ;;  %s992_s16 = int_to_ptr.vmem [resolvable:$false] %s991_s16 }
  0x44   : > { %s993_s6 = scalar_lea.vmem %s992_s16, 256  ;;  %p994_p5 = scmp.lt.s32.totalorder %s1245_s24, %s992_s16 }
  0x45   : > { %p989_p11 = pnand %p987_p12, %p973_p3  ;;  %p995_p9 = scmp.lt.s32.totalorder %s993_s6, %s986_s7 }
  0x47   : > { %p990_p0 = pneg %p989_p11  ;;  %p996_p1 = por %p995_p9, %p994_p5 }
  0x49   : > { %p997_p2 = pnand %p996_p1, %p990_p0 }
  0x4b   : > { %1000 = shalt.err (!%p997_p2)
}
  0x4c   : > { %s1444_s17 = smov 64   ;;  %p1445_p3 = scmp.ne.s32.totalorder %s1438_s30, 0 }
  0x4d   : > { %861 = dma.hbm_to_vmem [thread:$0]  (!%p1249_p13), %s1243_s10, 128, %s1245_s24, %s1253_s11, %s1444_s17, %s1444_s17, %s1091_s25  }
  0x4e   : > { %246 = sbr.rel (%p1445_p3) target bundleno = 1190 (0x4a6), region = 40  ;;  %s1287_s12 = sand.u32 (!%p1445_p3), 1, %s1071_s19  }
  0x4f   : > { %s783_s27 = sshll.u32 (!%p1445_p3), %s1287_s12, 3  ;;  %s249_s7 = scalar_lea.sflag (!%p1445_p3), [#allocation5], %s1287_s12 }
  0x50   : > { %s252_s14 = scalar_lea.vmem (!%p1445_p3), [#allocation4], %s783_s27  ;;  %p1446_p7 = scmp.ne.s32.totalorder (!%p1445_p3), %s1436_s28, 0 }
  0x55   : > { %1054 = dma.done.wait (%p1446_p7), %s249_s7, 128  }
  0x56   : > { %1056 = vsyncadd (%p1446_p7), %s249_s7, 4294967168  ;;  %p1447_p4 = scmp.ne.s32.totalorder %s1434_s26, 0 }
  0x58   : > { %1058 = dma.done.wait (%p1447_p4), [#allocation8], 128  }
  0x59   : > { %1060 = vsyncadd (%p1447_p4), [#allocation8], 4294967168  ;;  %p288_p13 = scmp.lt.s32.totalorder %s1079_s21, 1  ;;  %v1093_v0 = vmov 0.0   ;;  %vm1094_vm0 = vmmov 0   ;;  %v928_v1 = vld [vmem:[%s252_s14] sm:$0xff]  }
  0x5a   : > { %822 = vmatprep.subr.bf16.mxu1 %v1093_v0  ;;  %824 = vmatprep.mubr.msk.bf16.mxu1 %vm1094_vm0, %v1093_v0  ;;  %v929_v2 = vld [vmem:[%s1425_s2] sm:$0xff]   ;;  %vm313_vm1 = vcmask 130048   ;;  %v428_v24 = vld [vmem:[%s1427_s4 + $0x8] sm:$0xff]  ;;  %v1095_v25 = vmov 0   ;;  %vm362_vm2 = vcmask 122880   ;;  %s785_s14 = sshll.u32 %s1287_s12, 4 }
  0x5b   : > { %816 = vmatprep.subr.bf16.mxu0 %v1093_v0  ;;  %s289_s28 = scalar_select %p288_p13, %s1079_s21, 1  ;;  %818 = vmatprep.mubr.msk.bf16.mxu0 %vm1094_vm0, %v1093_v0  ;;  %v931_v4 = vld [vmem:[%s1425_s2] sm:$0xff]   ;;  %363 = vst.msk [vmem:[#allocation3] sm:$0x1] %vm362_vm2, %v1093_v0 }
  0x5c   : > { %823 = vmatpush3.bf16.msra.mxu1 %v928_v1  ;;  %v932_v17 = vld [vmem:[#allocation7] sm:$0xff]   ;;  %926 = vset.pattern.permute.xlu1 %v1095_v25  ;;  %s1096_s11 = smov [#allocation9]  }
  0x5d   : > { %s804_s30 = sshll.u32 %s289_s28, 3  ;;  %834 = vmatprep.subr.bf16.mxu1 %v1093_v0  ;;  %v427_v36 = vld [vmem:[%s1427_s4] sm:$0xff]  ;;  %s1343_s28 = scalar_lea.vmem [#allocation9], %s785_s14 }
  0x5e   : > { %s292_s25 = scalar_lea.vmem %s1423_s0, %s804_s30  ;;  %360 = vst.msk [vmem:[%s1343_s28] sm:$0xff] %vm313_vm1, %v1093_v0  ;;  %361 = vst.msk [vmem:[%s1343_s28 + $0x8] sm:$0xff] %vm313_vm1, %v1093_v0  ;;  %s805_s30 = sshll.u32 %s1079_s21, 8 }
  0x5f   : > { %v930_v3 = vld [vmem:[%s292_s25] sm:$0xff]   ;;  %825 = vmatmul.mubr.msk.bf16.vlgmr.msra.gmra.mrb[0].mxu1 %vm313_vm1, %v929_v2  ;;  %v646_v2 = vlaneseq  ;;  %s669_s24 = sshll.u32 %s1343_s28, 4  ;;  %s1368_s10 = scalar_lea.hbm %s1428_s5, %s805_s30  ;;  %s1370_s24 = int_to_ptr.vmem [resolvable:$true] %s669_s24 }
  0x60   : > { %817 = vmatpush3.bf16.msra.mxu0 %v930_v3  ;;  %836 = vmatprep.mubr.msk.bf16.mxu1 %vm1094_vm0, %v1093_v0  ;;  %s656_s21 = scalar_lea.sflag [#allocation6], %s1287_s12  ;;  %s1001_s13 = scalar_lea.vmem %s1370_s24, 256 }
  0x61   : > { %828 = vmatprep.subr.bf16.mxu0 %v1093_v0  ;;  %p1002_p6 = scmp.ne.s32.totalorder %s1370_s24, %s1001_s13  ;;  %s1005_s16 = sshll.u32 %s1096_s11, 4  ;;  %s1006_s16 = int_to_ptr.vmem [resolvable:$false] %s1005_s16 }
  0x62   : > { %v572_v61 = vld [vmem:[#allocation3] sm:$0x1]  ;;  %s1007_s6 = scalar_lea.vmem %s1006_s16, 512  ;;  %p1008_p11 = scmp.lt.s32.totalorder %s1370_s24, %s1006_s16 }
  0x63   : > { %819 = vmatmul.mubr.msk.bf16.vlgmr.msra.gmra.mrb[0].mxu0 %vm313_vm1, %v931_v4  ;;  %p1003_p8 = pnand %p1002_p6, %p1228_p10  ;;  %p1009_p0 = scmp.lt.s32.totalorder %s1007_s6, %s1001_s13 }
  0x64   : > { %829 = vmatpush3.bf16.msra.mxu0 %v928_v1  ;;  %830 = vmatprep.mubr.msk.bf16.mxu0 %vm1094_vm0, %v1093_v0 }
  0x65   : > { %840 = vmatprep.subr.bf16.mxu0 %v1093_v0  ;;  %v585_v3 = vld [vmem:[%s1343_s28] sm:$0xff]  ;;  %p1004_p12 = pneg %p1003_p8  ;;  %p1010_p5 = por %p1009_p0, %p1008_p11 }
  0x67   : > { %p1011_p9 = pnand %p1010_p5, %p1004_p12 }
  0x6b   : > { %831 = vmatmul.mubr.msk.bf16.vlgmr.msra.gmra.mrb[4].mxu0 %vm313_vm1, %v932_v17 }
  0x6c   : > { %842 = vmatprep.mubr.msk.bf16.mxu0 %vm1094_vm0, %v1093_v0 }
 0x132   : > { %v417_v5 = vpop.f32.mrb[0].mxu1 }
 0x133   : > { %v826_v6 = vpop.f32.mrb[1].mxu1 }
 0x134   : > { %v420_v7 = vpop.f32.mrb[2].mxu1 }
 0x135   : > { %v827_v9 = vpop.f32.mrb[3].mxu1  ;;  %v424_v10 = vpack.c.bf16 %v420_v7, %v417_v5  ;;  %v586_v5 = vld [vmem:[%s1343_s28 + $0x8] sm:$0xff] }
 0x136   : > { %v351_v8 = vpop.f32.mrb[0].mxu0 }
 0x137   : > { %v820_v11 = vpop.f32.mrb[1].mxu0  ;;  %490 = vxpose.xlu0.c.b16.start.end [1/1] (short) (narrow) %v424_v10, 16 }
 0x138   : > { %v354_v12 = vpop.f32.mrb[2].mxu0 }
 0x139   : > { %v358_v13 = vpack.c.bf16 %v354_v12, %v351_v8  ;;  %v821_v14 = vpop.f32.mrb[3].mxu0  ;;  %v647_v8 = vshrl.u32 %v646_v2, 7 }
 0x13b   : > { %359 = vst.msk [vmem:[#allocation2] sm:$0xff] %vm313_vm1, %v358_v13  ;;  %v648_v14 = vsub.s32 0, %v647_v8 }
 0x13e   : > { %v481_v37 = vpop.f32.mrb[4].mxu0 }
 0x13f   : > { %v832_v38 = vpop.f32.mrb[5].mxu0 }
 0x140   : > { %927 = vset.pattern.permute.xlu0 %v1095_v25  ;;  %v484_v39 = vpop.f32.mrb[6].mxu0 }
 0x141   : > { %v833_v40 = vpop.f32.mrb[7].mxu0 }
 0x142   : > { %v489_v15 = vld [vmem:[#allocation2] sm:$0xff] }
 0x143   : > { %835 = vmatpush3.bf16.msra.mxu1 %v489_v15 }
 0x19d   : > { %v498_v16 = vpop.trf.xlu0 }
 0x19e   : > { %837 = vmatmul.mubr.msk.bf16.vlgmr.msra.gmra.mrb[4].mxu1 %vm313_vm1, %v498_v16 }
 0x271   : > { %v543_v18 = vpop.f32.mrb[4].mxu1 }
 0x272   : > { %v838_v19 = vpop.f32.mrb[5].mxu1  ;;  %v550_v20 = vsel %vm313_vm1, %v543_v18, -inf }
 0x273   : > { %551 = vmax.xlane.f32.xlu0 %v550_v20  ;;  %v546_v21 = vpop.f32.mrb[6].mxu1 }
 0x274   : > { %v839_v22 = vpop.f32.mrb[7].mxu1  ;;  %v553_v23 = vsel %vm313_vm1, %v546_v21, -inf }
 0x275   : > { %554 = vmax.xlane.f32.xlu1 %v553_v23 }
 0x289   : > { %436 = vperm.xlu0 %927, %v428_v24  }
 0x300   : > { %v552_v26 = vpop.xlane.xlu0 %551 }
 0x301   : > { %v556_v27 = vsub.f32 %v543_v18, %v552_v26 }
 0x302   : > { %v555_v28 = vpop.xlane.xlu1 %554 }
 0x303   : > { %v558_v29 = vmul.f32 1.442695, %v556_v27  ;;  %v557_v30 = vsub.f32 %v546_v21, %v555_v28 }
 0x305   : > { %933 = vpow2.f32 %v558_v29  ;;  %v560_v31 = vmul.f32 1.442695, %v557_v30 }
 0x307   : > { %935 = vpow2.f32 %v560_v31 }
 0x308   : > { %v437_v43 = vpop.permute.xlu0 %436 }
 0x309   : > { %v485_v44 = vadd.f32 %v484_v39, %v437_v43 }
 0x30f   : > { %v934_v32 = vpop.eup %933 }
 0x310   : > { %v562_v33 = vsel %vm313_vm1, %v934_v32, 0.0 }
 0x311   : > { %v936_v34 = vpop.eup %935  ;;  %563 = vadd.xlane.f32.xlu1 %v562_v33 }
 0x312   : > { %v565_v35 = vsel %vm313_vm1, %v936_v34, 0.0 }
 0x315   : > { %566 = vadd.xlane.f32.xlu1 %v565_v35 }
 0x326   : > { %431 = vperm.xlu1 %926, %v427_v36  }
 0x39e   : > { %v564_v41 = vpop.xlane.xlu1 %563 }
 0x39f   : > { %937 = vrcp.f32 %v564_v41 }
 0x3a2   : > { %v567_v42 = vpop.xlane.xlu1 %566 }
 0x3a3   : > { %939 = vrcp.f32 %v567_v42 }
 0x3a6   : > { %v432_v45 = vpop.permute.xlu1 %431 }
 0x3a7   : > { %v482_v46 = vadd.f32 %v481_v37, %v432_v45 }
 0x3a9   : > { %v938_v47 = vpop.eup %937  ;;  %v488_v48 = vpack.c.bf16 %v485_v44, %v482_v46 }
 0x3aa   : > { %v570_v49 = vmul.f32 %v938_v47, %v934_v32 }
 0x3ac   : > { %v573_v52 = vsel %vm313_vm1, %v570_v49, 0.0 }
 0x3ad   : > { %v940_v50 = vpop.eup %939 }
 0x3ae   : > { %v571_v51 = vmul.f32 %v940_v50, %v936_v34 }
 0x3b0   : > { %v574_v53 = vsel %vm313_vm1, %v571_v51, 0.0  ;;  %v587_v54 = vpack.c.bf16 %v571_v51, %v570_v49 }
 0x3b1   : > { %v575_v55 = vadd.f32 %v574_v53, %v573_v52 }
 0x3b2   : > { %841 = vmatpush3.bf16.msra.mxu0 %v587_v54 }
 0x3b3   : > { %v576_v56 = vrot.slane %v575_v55, 4 }
 0x3b5   : > { %v577_v57 = vadd.f32 %v576_v56, %v575_v55  ;;  %843 = vmatmul.mubr.msk.bf16.vlgmr.msra.gmra.mrb[8].mxu0 %vm313_vm1, %v488_v48 }
 0x3b7   : > { %v578_v58 = vrot.slane %v577_v57, 2 }
 0x3b9   : > { %v579_v59 = vadd.f32 %v578_v58, %v577_v57 }
 0x3bb   : > { %v580_v60 = vrot.slane %v579_v59, 1 }
 0x3bd   : > { %v581_v62 = vadd.f32 %v580_v60, %v579_v59 }
 0x3bf   : > { %v582_v63 = vadd.f32 %v581_v62, %v572_v61 }
 0x3c1   : > { %584 = vst.msk [vmem:[#allocation3] sm:$0x1] %vm362_vm2, %v582_v63 }
 0x3c8   : > { %v639_v0 = vld [vmem:[#allocation3] sm:$0x1] }
 0x3c9   : > { %v640_v1 = vadd.f32 1e-09, %v639_v0 }
 0x3cb   : > { %941 = vrcp.f32 %v640_v1 }
 0x3d5   : > { %v942_v9 = vpop.eup %941 }
 0x3d6   : > { %v642_v13 = vmul.f32 0.5, %v942_v9 }
 0x3d8   : > { %v649_v15 = vrot.slane %v642_v13, %v648_v14 }
 0x488   : > { %v625_v4 = vpop.f32.mrb[8].mxu0 }
 0x489   : > { %v632_v6 = vadd.f32 %v625_v4, %v585_v3  ;;  %v844_v7 = vpop.f32.mrb[9].mxu0 }
 0x48a   : > { %v628_v10 = vpop.f32.mrb[10].mxu0 }
 0x48b   : > { %634 = vst.msk [vmem:[%s1343_s28] sm:$0xff] %vm313_vm1, %v632_v6  ;;  %v633_v11 = vadd.f32 %v628_v10, %v586_v5  ;;  %v845_v12 = vpop.f32.mrb[11].mxu0 }
 0x48d   : > { %635 = vst.msk [vmem:[%s1343_s28 + $0x8] sm:$0xff] %vm313_vm1, %v633_v11 }
 0x492   : > { %v643_v16 = vld [vmem:[%s1343_s28] sm:$0xff] }
 0x493   : > { %v651_v17 = vmul.f32 %v649_v15, %v643_v16 }
 0x494   : > { %v644_v18 = vld [vmem:[%s1343_s28 + $0x8] sm:$0xff] }
 0x495   : > { %v652_v19 = vmul.f32 %v649_v15, %v644_v18  ;;  %653 = vst.msk [vmem:[%s1343_s28] sm:$0xff] %vm313_vm1, %v651_v17 }
 0x497   : > { %654 = vst.msk [vmem:[%s1343_s28 + $0x8] sm:$0xff] %vm313_vm1, %v652_v19 }
 0x498   : > { %1014 = shalt.err (!%p1011_p9)
}
 0x499   : > { %s1015_s17 = scalar_lea.hbm %s1368_s10, 256  ;;  %s1019_s14 = scalar_lea.hbm %s1428_s5, 512 }
 0x49a   : > { %p1016_p1 = scmp.ne.s32.totalorder %s1368_s10, %s1015_s17  ;;  %p1020_p7 = scmp.lt.u32.totalorder %s1368_s10, %s1428_s5 }
 0x49b   : > { %p1021_p4 = scmp.lt.u32.totalorder %s1019_s14, %s1015_s17  ;;  %p1023_p6 = scmp.lt.u32.totalorder %s1015_s17, %s1368_s10 }
 0x49c   : > { %p1017_p2 = pnand %p1016_p1, %p1228_p10 }
 0x49d   : > { %p1022_p13 = por %p1021_p4, %p1020_p7 }
 0x49e   : > { %p1018_p3 = pneg %p1017_p2 }
 0x49f   : > { %p1024_p8 = por %p1023_p6, %p1022_p13 }
 0x4a1   : > { %p1025_p12 = pnand %p1024_p8, %p1018_p3 }
 0x4a3   : > { %1028 = shalt.err (!%p1025_p12)
}
 0x4a4   : > { %s1097_s26 = smov 128   ;;  %s1098_s25 = smov 8  }
 0x4a5   : > { %852 = dma.vmem_to_hbm [thread:$0]  (%p1228_p10), %s1370_s24, 256, %s1368_s10, %s656_s21, %s1097_s26, %s1097_s26, %s1098_s25  }
 0x4a6 PF: > { %s684_s13 = sand.u32 1, %s1067_s18   ;;  %p1448_p11 = scmp.ne.s32.totalorder %s1437_s29, 0 }
 0x4a7   : > { %p1449_p0 = scmp.ge.s32.totalorder %s1087_s23, 2  ;;  %s685_s11 = scalar_lea.sflag [#allocation6], %s684_s13 }
 0x4a9   : > { %p863_p5 = pnand %p1449_p0, %p1448_p11 }
 0x4ab   : > { %1062 = dma.done.wait (!%p863_p5), %s685_s11, 256  }
 0x4ac   : > { %1064 = vsyncadd (!%p863_p5), %s685_s11, 4294967040  ;;  %s22_s23 = sadd.s32 1, %s1087_s23   ;;  %s1450_s18 = smov %s1071_s19 }
 0x4ad   : > { %p19_p9 = scmp.ge.s32.totalorder %s22_s23, 4   ;;  %s1451_s19 = smov %s1075_s20 }
 0x4ae   : > { %s1452_s20 = smov %s1237_s15  ;;  %s1453_s21 = smov %s1083_s22 }
 0x4af   : > { %s1454_s22 = smov %s1456_s9  ;;  %21 = sbr.rel (!%p19_p9) target bundleno = 7 (0x7), region = 100 }
 0x4b6   :  { %690 = vsyncpa [#allocation5], 1 }
 0x4b7   :  { %692 = vsyncpa [#allocation5 + $0x1], 1 }
 0x4b8   :  { %693 = vsyncpa [#allocation8], 1 }
 0x4b9   :  { %694 = vsyncpa [#allocation6], 1 }
 0x4ba   :  { %696 = vsyncpa [#allocation6 + $0x1], 1 }

</bundles_post_ra>
